<compile_context>
chip_gen: v7x
topology: tpu7x:2x2x1
jax: 0.10.0
libtpu: 0.0.40
codegen_flags: <defaults>
</compile_context>

<pallas_src>
import functools
import math

import numpy as np
import jax
import jax.numpy as jnp
from jax.experimental import pallas as pl
from jax.experimental.pallas import tpu as pltpu


# ---------------------------------------------------------------------------
# Fast in-kernel sin: Cody-Waite range reduction mod 2*pi + degree-13 Taylor.
# ---------------------------------------------------------------------------
_TWO_PI_INV = 0.15915494309189535          # 1 / (2*pi)
_CW_C1 = 6.25                              # 5-bit mantissa: k * C1 exact for |k| < 2^19
_CW_C2 = 0.033203125                       # 17/512, 5-bit mantissa: k * C2 exact
_CW_C3 = float(2.0 * np.pi - 6.25 - 0.033203125)   # residual (~ -1.78e-5)


def _fast_sin(x):
    """sin(x) for f32 phases; error ~2.5e-5 abs + a few ulps of |x| (reduction)."""
    k = jnp.floor(x * _TWO_PI_INV + 0.5)   # nearest multiple of 2*pi
    r = x - k * _CW_C1
    r = r - k * _CW_C2
    r = r - k * _CW_C3                     # r in ~[-pi, pi]
    r2 = r * r
    p = jnp.float32(1.0 / 6227020800.0)    #  1/13!
    p = p * r2 + jnp.float32(-1.0 / 39916800.0)
    p = p * r2 + jnp.float32(1.0 / 362880.0)
    p = p * r2 + jnp.float32(-1.0 / 5040.0)
    p = p * r2 + jnp.float32(1.0 / 120.0)
    p = p * r2 + jnp.float32(-1.0 / 6.0)
    p = p * r2 + jnp.float32(1.0)
    return p * r


# ---------------------------------------------------------------------------
# Kernel
# ---------------------------------------------------------------------------
def _pos_encoding_kernel(pos_ref, inv_ref, sft_ref, out_ref, *, use_fast_sin):
    # pos_ref : (TR, G)      f32 -- G positions packed per output row
    # inv_ref : (G, G*dim)   f32 -- row g holds 1/base in lanes [g*dim,(g+1)*dim), else 0
    # sft_ref : (1, G*dim)   f32 -- phase shift, tiled G times
    # out_ref : (TR, G*dim)  lane-dense (G*dim is a multiple of 128 whenever possible)
    pos = pos_ref[...]
    inv = inv_ref[...]
    x = sft_ref[...]                               # (1, G*dim), broadcasts up
    g = pos.shape[1]
    for gg in range(g):                            # G FMAs/elem, no iota / idiv / select
        x = x + pos[:, gg:gg + 1] * inv[gg:gg + 1, :]
    s = _fast_sin(x) if use_fast_sin else jnp.sin(x)
    out_ref[...] = s.astype(out_ref.dtype)


# ---------------------------------------------------------------------------
# Host-side parameter construction (matches PosEncoding.__init__), done once.
# ---------------------------------------------------------------------------
def make_pos_encoding_params(dim, base=10000, bias=0.0, *, max_group=16,
                             max_lanes=1024):
    i = np.arange(dim)
    b = (i - i % 2) / float(dim)
    inv_base = np.power(float(base), b)            # == 1 / base ** (-b)
    sft = np.where(i % 2 == 1, np.pi / 2.0 + bias, float(bias))

    lanes = math.lcm(dim, 128)                     # lane-dense packing group
    group = lanes // dim
    if group > max_group or lanes > max_lanes:
        group = 1  # TODO(synk): pad-dim-to-128 path for awkward dims (correct, masked stores)
    gd = group * dim

    inv_masked = np.zeros((group, gd), np.float32)
    for g in range(group):
        inv_masked[g, g * dim:(g + 1) * dim] = inv_base
    sft_tiled = np.tile(sft.astype(np.float32)[None, :], (1, group))
    return (jnp.asarray(inv_masked), jnp.asarray(sft_tiled), int(dim), int(group))


def _round_up(a, m):
    return -(-a // m) * m


# ---------------------------------------------------------------------------
# Wrapper
# ---------------------------------------------------------------------------
def pos_encoding(pos, params, *, block_rows=None, out_dtype=jnp.float32,
                 use_fast_sin=True):
    """Forward pass of PosEncoding: returns sin(pos[:, None] / base + sft), shape (N, dim)."""
    inv_masked, sft_tiled, dim, group = params
    gd = group * dim

    pos = jnp.asarray(pos, jnp.float32).reshape(-1)
    n = pos.shape[0]

    rows = -(-n // group)
    rows_pad = _round_up(max(rows, 1), 8)          # sublane multiple; pad touches pos only
    n_pack = rows_pad * group
    if n_pack != n:
        pos = jnp.zeros((n_pack,), jnp.float32).at[:n].set(pos)
    pos2d = pos.reshape(rows_pad, group)           # group-major packing

    if block_rows is None:
        target = 2048                              # 1 MiB f32 out block; ~10% step overhead
        if rows_pad <= 8:
            block_rows = 8
        elif rows_pad <= 2 * target:
            # keep >= 2 grid steps so v7x's two TensorCores both get a share
            block_rows = _round_up(-(-rows_pad // 2), 8)
        else:
            block_rows = target
    block_rows = min(block_rows, rows_pad)
    assert block_rows % 8 == 0, "block_rows must be a multiple of 8 (sublane)"

    grid = (-(-rows_pad // block_rows),)           # ragged last block handled by Pallas

    elems = rows_pad * gd
    cost = pl.CostEstimate(
        flops=elems * (2 * group + 20),
        transcendentals=elems,
        bytes_accessed=(elems * jnp.dtype(out_dtype).itemsize
                        + rows_pad * group * 4 + (group + 1) * gd * 4),
    )

    out = pl.pallas_call(
        functools.partial(_pos_encoding_kernel, use_fast_sin=use_fast_sin),
        out_shape=jax.ShapeDtypeStruct((rows_pad, gd), out_dtype),
        grid_spec=pltpu.PrefetchScalarGridSpec(
            num_scalar_prefetch=0,
            grid=grid,
            in_specs=[
                pl.BlockSpec((block_rows, group), lambda i: (i, 0)),   # packed positions
                pl.BlockSpec((group, gd), lambda i: (0, 0)),           # group-masked 1/base
                pl.BlockSpec((1, gd), lambda i: (0, 0)),               # phase shifts
            ],
            out_specs=pl.BlockSpec((block_rows, gd), lambda i: (i, 0)),
        ),
        compiler_params=pltpu.CompilerParams(
            dimension_semantics=("parallel",),
            vmem_limit_bytes=32 * 1024 * 1024,
        ),
        cost_estimate=cost,
    )(pos2d, inv_masked, sft_tiled)

    # Group-major packing: out[r, g*dim + d] is position r*group + g, so a
    # contiguous reshape recovers (N, dim) for free; slice only if we padded.
    out = out.reshape(n_pack, dim)
    if n_pack != n:
        out = out[:n]
    return out


# ---------------------------------------------------------------------------
# Self-test
# ---------------------------------------------------------------------------
def _reference_and_tol(pos_np, dim, base, bias):
    i = np.arange(dim)
    b = (i - i % 2) / float(dim)
    base_neg = np.power(float(base), -b)
    sft = np.where(i % 2 == 1, np.pi / 2.0 + bias, float(bias))
    phase = pos_np.astype(np.float64).reshape(-1, 1) / base_neg[None, :] + sft[None, :]
    ref = np.sin(phase)
    # sin at |phase| up to pos * 10000^((dim-2)/dim) is ill-conditioned in f32:
    # each ulp of phase rounding moves the result by ~|phase| * 2^-24.  Budget
    # 16 phase ulps plus a small absolute floor (fast-sin poly adds < 3e-5).
    tol = 1e-4 + np.abs(phase) * (2.0 ** -20)
    return ref, tol


if __name__ == "__main__":
    dim, base, bias = 32, 10000, 0.0
    params = make_pos_encoding_params(dim, base=base, bias=bias)

    @jax.jit
    def encode(p):
        return pos_encoding(p, params)

    key = jax.random.PRNGKey(0)
    k1, k2 = jax.random.split(key)

    # Small shape consistent with the module: 8 positions, encoding dim 32.
    pos_small = jax.random.randint(k1, (8,), 0, 64).astype(jnp.float32)
    out_small = jax.block_until_ready(encode(pos_small))
    ref, tol = _reference_and_tol(np.asarray(pos_small), dim, base, bias)
    err = np.abs(np.asarray(out_small, np.float64) - ref)
    assert out_small.shape == (8, dim)
    assert np.all(err <= tol), f"small: max err {err.max():.3e} exceeds tolerance"

    # Larger run exercising the multi-step "parallel" grid (2 x 2048-row tiles)
    # and the zero-pad / zero-slice fast path (N is a multiple of 8*group).
    pos_big = jax.random.randint(k2, (16384,), 0, 128).astype(jnp.float32)
    out_big = jax.block_until_ready(encode(pos_big))
    ref, tol = _reference_and_tol(np.asarray(pos_big), dim, base, bias)
    err = np.abs(np.asarray(out_big, np.float64) - ref)
    assert out_big.shape == (16384, dim)
    assert np.all(err <= tol), f"big: max err {err.max():.3e} exceeds tolerance"

    print("KERNEL_OK")
</pallas_src>

<mosaic_0001>
module attributes {stable_mosaic.version = 11 : i64} {
  func.func @_pos_encoding_kernel(%arg0: i32, %arg1: memref<8x4xf32, #tpu.memory_space<vmem>>, %arg2: memref<4x128xf32, #tpu.memory_space<vmem>>, %arg3: memref<1x128xf32, #tpu.memory_space<vmem>>, %arg4: memref<8x128xf32, #tpu.memory_space<vmem>>) attributes {dimension_semantics = [#tpu.dimension_semantics<parallel>], iteration_bounds = array<i64: 1>, scalar_prefetch = 0 : i64, scratch_operands = 0 : i64, tpu.core_type = #tpu.core_type<tc>, window_params = [{transform_indices = @transform_0, window_bounds = array<i64: 8, 4>}, {pipeline_mode = #tpu.pipeline_mode<synchronous>, transform_indices = @transform_1, window_bounds = array<i64: 4, 128>}, {pipeline_mode = #tpu.pipeline_mode<synchronous>, transform_indices = @transform_2, window_bounds = array<i64: 1, 128>}, {transform_indices = @transform_3, window_bounds = array<i64: 8, 128>}]} {
    %c0 = arith.constant 0 : index
    %c0_0 = arith.constant 0 : index
    %0 = vector.load %arg1[%c0, %c0_0] : memref<8x4xf32, #tpu.memory_space<vmem>>, vector<8x4xf32>
    %c0_1 = arith.constant 0 : index
    %c0_2 = arith.constant 0 : index
    %1 = vector.load %arg2[%c0_1, %c0_2] : memref<4x128xf32, #tpu.memory_space<vmem>>, vector<4x128xf32>
    %c0_3 = arith.constant 0 : index
    %c0_4 = arith.constant 0 : index
    %2 = vector.load %arg3[%c0_3, %c0_4] : memref<1x128xf32, #tpu.memory_space<vmem>>, vector<1x128xf32>
    %3 = vector.extract_strided_slice %0 {offsets = [0, 0], sizes = [8, 1], strides = [1, 1]} : vector<8x4xf32> to vector<8x1xf32>
    %4 = vector.extract_strided_slice %1 {offsets = [0, 0], sizes = [1, 128], strides = [1, 1]} : vector<4x128xf32> to vector<1x128xf32>
    %5 = vector.broadcast %3 : vector<8x1xf32> to vector<8x128xf32>
    %6 = vector.broadcast %4 : vector<1x128xf32> to vector<8x128xf32>
    %7 = arith.mulf %5, %6 : vector<8x128xf32>
    %8 = vector.broadcast %2 : vector<1x128xf32> to vector<8x128xf32>
    %9 = arith.addf %8, %7 : vector<8x128xf32>
    %10 = vector.extract_strided_slice %0 {offsets = [0, 1], sizes = [8, 1], strides = [1, 1]} : vector<8x4xf32> to vector<8x1xf32>
    %11 = vector.extract_strided_slice %1 {offsets = [1, 0], sizes = [1, 128], strides = [1, 1]} : vector<4x128xf32> to vector<1x128xf32>
    %12 = vector.broadcast %10 : vector<8x1xf32> to vector<8x128xf32>
    %13 = vector.broadcast %11 : vector<1x128xf32> to vector<8x128xf32>
    %14 = arith.mulf %12, %13 : vector<8x128xf32>
    %15 = arith.addf %9, %14 : vector<8x128xf32>
    %16 = vector.extract_strided_slice %0 {offsets = [0, 2], sizes = [8, 1], strides = [1, 1]} : vector<8x4xf32> to vector<8x1xf32>
    %17 = vector.extract_strided_slice %1 {offsets = [2, 0], sizes = [1, 128], strides = [1, 1]} : vector<4x128xf32> to vector<1x128xf32>
    %18 = vector.broadcast %16 : vector<8x1xf32> to vector<8x128xf32>
    %19 = vector.broadcast %17 : vector<1x128xf32> to vector<8x128xf32>
    %20 = arith.mulf %18, %19 : vector<8x128xf32>
    %21 = arith.addf %15, %20 : vector<8x128xf32>
    %22 = vector.extract_strided_slice %0 {offsets = [0, 3], sizes = [8, 1], strides = [1, 1]} : vector<8x4xf32> to vector<8x1xf32>
    %23 = vector.extract_strided_slice %1 {offsets = [3, 0], sizes = [1, 128], strides = [1, 1]} : vector<4x128xf32> to vector<1x128xf32>
    %24 = vector.broadcast %22 : vector<8x1xf32> to vector<8x128xf32>
    %25 = vector.broadcast %23 : vector<1x128xf32> to vector<8x128xf32>
    %26 = arith.mulf %24, %25 : vector<8x128xf32>
    %27 = arith.addf %21, %26 : vector<8x128xf32>
    %cst = arith.constant 0.159154937 : f32
    %28 = vector.broadcast %cst : f32 to vector<8x128xf32>
    %29 = arith.mulf %27, %28 : vector<8x128xf32>
    %cst_5 = arith.constant 5.000000e-01 : f32
    %30 = vector.broadcast %cst_5 : f32 to vector<8x128xf32>
    %31 = arith.addf %29, %30 : vector<8x128xf32>
    %32 = math.floor %31 : vector<8x128xf32>
    %cst_6 = arith.constant 6.250000e+00 : f32
    %33 = vector.broadcast %cst_6 : f32 to vector<8x128xf32>
    %34 = arith.mulf %32, %33 : vector<8x128xf32>
    %35 = arith.subf %27, %34 : vector<8x128xf32>
    %cst_7 = arith.constant 0.033203125 : f32
    %36 = vector.broadcast %cst_7 : f32 to vector<8x128xf32>
    %37 = arith.mulf %32, %36 : vector<8x128xf32>
    %38 = arith.subf %35, %37 : vector<8x128xf32>
    %cst_8 = arith.constant -1.78178198E-5 : f32
    %39 = vector.broadcast %cst_8 : f32 to vector<8x128xf32>
    %40 = arith.mulf %32, %39 : vector<8x128xf32>
    %41 = arith.subf %38, %40 : vector<8x128xf32>
    %42 = arith.mulf %41, %41 : vector<8x128xf32>
    %cst_9 = arith.constant 1.60590444E-10 : f32
    %43 = vector.broadcast %cst_9 : f32 to vector<8x128xf32>
    %44 = arith.mulf %43, %42 : vector<8x128xf32>
    %cst_10 = arith.constant -2.50521079E-8 : f32
    %45 = vector.broadcast %cst_10 : f32 to vector<8x128xf32>
    %46 = arith.addf %44, %45 : vector<8x128xf32>
    %47 = arith.mulf %46, %42 : vector<8x128xf32>
    %cst_11 = arith.constant 2.75573188E-6 : f32
    %48 = vector.broadcast %cst_11 : f32 to vector<8x128xf32>
    %49 = arith.addf %47, %48 : vector<8x128xf32>
    %50 = arith.mulf %49, %42 : vector<8x128xf32>
    %cst_12 = arith.constant -1.98412701E-4 : f32
    %51 = vector.broadcast %cst_12 : f32 to vector<8x128xf32>
    %52 = arith.addf %50, %51 : vector<8x128xf32>
    %53 = arith.mulf %52, %42 : vector<8x128xf32>
    %cst_13 = arith.constant 0.00833333377 : f32
    %54 = vector.broadcast %cst_13 : f32 to vector<8x128xf32>
    %55 = arith.addf %53, %54 : vector<8x128xf32>
    %56 = arith.mulf %55, %42 : vector<8x128xf32>
    %cst_14 = arith.constant -0.166666672 : f32
    %57 = vector.broadcast %cst_14 : f32 to vector<8x128xf32>
    %58 = arith.addf %56, %57 : vector<8x128xf32>
    %59 = arith.mulf %58, %42 : vector<8x128xf32>
    %cst_15 = arith.constant 1.000000e+00 : f32
    %60 = vector.broadcast %cst_15 : f32 to vector<8x128xf32>
    %61 = arith.addf %59, %60 : vector<8x128xf32>
    %62 = arith.mulf %61, %41 : vector<8x128xf32>
    %c0_16 = arith.constant 0 : index
    %c0_17 = arith.constant 0 : index
    %63 = vector.load %arg4[%c0_16, %c0_17] : memref<8x128xf32, #tpu.memory_space<vmem>>, vector<8x128xf32>
    tpu.vector_store %arg4[%c0_16, %c0_17], %62 {strides = array<i32>} : memref<8x128xf32, #tpu.memory_space<vmem>>, vector<8x128xf32>,
    return
  }
  func.func @transform_0(%arg0: i32) -> (i32, i32) {
    %c0_i32 = arith.constant 0 : i32
    %c0_i32_0 = arith.constant 0 : i32
    return %arg0, %c0_i32 : i32, i32
  }
  func.func @transform_1(%arg0: i32) -> (i32, i32) {
    %c0_i32 = arith.constant 0 : i32
    %c0_i32_0 = arith.constant 0 : i32
    %c0_i32_1 = arith.constant 0 : i32
    return %c0_i32, %c0_i32_0 : i32, i32
  }
  func.func @transform_2(%arg0: i32) -> (i32, i32) {
    %c0_i32 = arith.constant 0 : i32
    %c0_i32_0 = arith.constant 0 : i32
    %c0_i32_1 = arith.constant 0 : i32
    return %c0_i32, %c0_i32_0 : i32, i32
  }
  func.func @transform_3(%arg0: i32) -> (i32, i32) {
    %c0_i32 = arith.constant 0 : i32
    %c0_i32_0 = arith.constant 0 : i32
    return %arg0, %c0_i32 : i32, i32
  }
}

</mosaic_0001>

<bundles_post_ra>
// kernel: encode.1
= control target key start
LH: loop header
LB: loop body
LE: loop exit
PB: predicated region body
PF: predicated region fallthrough
CT: control target
= control target key end

     0   :  { %v102_v0 = vmov 0   ;;  %v103_v2 = vmov 2   ;;  %v104_v3 = vmov 1   ;;  %v105_v4 = vmov 3   ;;  %s138_s0 = inlined_call_operand.vmem [shape: f32[8,4], index: 0, kind: input, shape index: {}]   ;;  %s139_s1 = inlined_call_operand.vmem [shape: f32[4,128], index: 1, kind: input, shape index: {}]   ;;  %s140_s2 = inlined_call_operand.vmem [shape: f32[1,128], index: 2, kind: input, shape index: {}]   ;;  %s141_s3 = inlined_call_operand.vmem [shape: f32[8,128], index: 3, kind: output, shape index: {}]  }
   0x1   :  { %97 = vset.pattern.permute.xlu0 %v102_v0  ;;  %v14_v1 = vld [vmem:[%s138_s0] sm:$0xff]  ;;  %99 = vset.pattern.permute.xlu1 %v103_v2  ;;  %v22_v5 = vlaneseq }
   0x2   :  { %19 = vperm.xlu0 %97, %v14_v1   ;;  %45 = vperm.xlu1 %99, %v14_v1   ;;  %v15_v8 = vld [vmem:[%s139_s1] sm:$0xf] }
   0x3   :  { %v23_v6 = vshrl.u32 %v22_v5, 7  ;;  %v92_v17 = vld [vmem:[%s140_s2] ss:$0 sm:$0xff] }
   0x5   :  { %v24_v7 = vsub.s32 0, %v23_v6  ;;  %v40_v10 = vsub.s32 1, %v23_v6  ;;  %v50_v12 = vsub.s32 2, %v23_v6  ;;  %v60_v14 = vsub.s32 3, %v23_v6 }
   0x6   :  { %98 = vset.pattern.permute.xlu0 %v104_v3  ;;  %100 = vset.pattern.permute.xlu1 %v105_v4 }
   0x7   :  { %35 = vperm.xlu0 %98, %v14_v1   ;;  %55 = vperm.xlu1 %100, %v14_v1   ;;  %v25_v9 = vrot.slane %v15_v8, %v24_v7  ;;  %v41_v16 = vrot.slane %v15_v8, %v40_v10  ;;  %v51_v18 = vrot.slane %v15_v8, %v50_v12 }
   0x8   :  { %v61_v19 = vrot.slane %v15_v8, %v60_v14 }
   0xb   :  { %101 = vset.pattern.permute.xlu0 %v105_v4 }
  0x81   :  { %v20_v11 = vpop.permute.xlu0 %19  ;;  %v46_v13 = vpop.permute.xlu1 %45 }
  0x82   :  { %v26_v15 = vmul.f32 %v25_v9, %v20_v11  ;;  %v52_v24 = vmul.f32 %v51_v18, %v46_v13 }
  0x84   :  { %v33_v22 = vadd.f32 %v92_v17, %v26_v15 }
  0x86   :  { %v36_v20 = vpop.permute.xlu0 %35  ;;  %v56_v21 = vpop.permute.xlu1 %55 }
  0x87   :  { %v42_v23 = vmul.f32 %v41_v16, %v36_v20  ;;  %v62_v26 = vmul.f32 %v61_v19, %v56_v21 }
  0x89   :  { %v43_v25 = vadd.f32 %v42_v23, %v33_v22 }
  0x8b   :  { %v53_v27 = vadd.f32 %v52_v24, %v43_v25 }
  0x8d   :  { %v63_v28 = vadd.f32 %v62_v26, %v53_v27 }
  0x8f   :  { %v64_v29 = vmul.f32 0.15915494, %v63_v28 }
  0x91   :  { %v65_v30 = vadd.f32 0.5, %v64_v29 }
  0x93   :  { %v66_v31 = vfloor.f32 %v65_v30 }
  0x95   :  { %v67_v32 = vmul.f32 6.25, %v66_v31  ;;  %v69_v34 = vmul.f32 0.033203125, %v66_v31  ;;  %v71_v36 = vmul.f32 -1.781782e-05, %v66_v31 }
  0x97   :  { %v68_v33 = vsub.f32 %v63_v28, %v67_v32 }
  0x99   :  { %v70_v35 = vsub.f32 %v68_v33, %v69_v34 }
  0x9b   :  { %v72_v37 = vsub.f32 %v70_v35, %v71_v36 }
  0x9d   :  { %v73_v38 = vmul.f32 %v72_v37, %v72_v37 }
  0x9f   :  { %v74_v39 = vmul.f32 1.6059044e-10, %v73_v38 }
  0xa1   :  { %v75_v40 = vadd.f32 -2.5052108e-08, %v74_v39 }
  0xa3   :  { %v76_v41 = vmul.f32 %v75_v40, %v73_v38 }
  0xa5   :  { %v77_v42 = vadd.f32 2.7557319e-06, %v76_v41 }
  0xa7   :  { %v78_v43 = vmul.f32 %v77_v42, %v73_v38 }
  0xa9   :  { %v79_v44 = vadd.f32 -0.0001984127, %v78_v43 }
  0xab   :  { %v80_v45 = vmul.f32 %v79_v44, %v73_v38 }
  0xad   :  { %v81_v46 = vadd.f32 0.008333334, %v80_v45 }
  0xaf   :  { %v82_v47 = vmul.f32 %v81_v46, %v73_v38 }
  0xb1   :  { %v83_v48 = vadd.f32 -0.16666667, %v82_v47 }
  0xb3   :  { %v84_v49 = vmul.f32 %v83_v48, %v73_v38 }
  0xb5   :  { %v85_v50 = vadd.f32 1.0, %v84_v49 }
  0xb7   :  { %v86_v51 = vmul.f32 %v85_v50, %v72_v37 }
  0xb9   :  { %87 = vst [vmem:[%s141_s3] sm:$0xff] %v86_v51 }

</bundles_post_ra>
